<compile_context>
chip_gen: v7x
topology: tpu7x:2x2x1
jax: 0.10.0
libtpu: 0.0.40
codegen_flags: <defaults>
</compile_context>

<pallas_src>
import math

import jax
import jax.numpy as jnp
from jax.experimental import pallas as pl
from jax.experimental.pallas import tpu as pltpu


def _round_up(x, m):
    return (x + m - 1) // m * m


def _padded_block_bytes(bt, Lq, Lk, D, itemsize):
    # Padded-to-(8,128) VMEM footprint of one grid step's blocks (q,k,v,mask,out).
    qb = bt * _round_up(Lq, 8) * _round_up(D, 128)
    kb = bt * _round_up(Lk, 8) * _round_up(D, 128)
    vb = kb
    mb = bt * _round_up(Lq, 8) * _round_up(Lk, 128)
    ob = qb
    return (qb + kb + vb + mb + ob) * itemsize


def _pick_batch_block(B, Lq, Lk, D, itemsize, vmem_budget=8 * 1024 * 1024):
    """Largest divisor of B whose double-buffered padded blocks fit the budget.

    A single grid step (bt == B) is preferred: the grid is a serial loop on
    v5e/v6e, and at these tiny per-step sizes sharding across v7x's two
    TensorCores cannot recover the extra per-step overhead.
    """
    best = 1
    for d in range(1, B + 1):
        if B % d == 0 and 2 * _padded_block_bytes(d, Lq, Lk, D, itemsize) <= vmem_budget:
            best = d
    return best


def attention(q, k, v, mask):
    B, Lq, D = q.shape
    _, Lk, _ = k.shape
    assert k.shape == (B, Lk, D)
    assert v.shape == (B, Lk, D)
    assert mask.shape == (B, Lq, Lk)

    inv_scale = 1.0 / math.sqrt(D)  # emb_size == D in the reference module
    itemsize = jnp.dtype(q.dtype).itemsize
    bt = _pick_batch_block(B, Lq, Lk, D, itemsize)
    grid = (B // bt,)

    def _attn_kernel(q_ref, k_ref, v_ref, mask_ref, o_ref):
        # q_ref: (bt, Lq, D)   k_ref/v_ref: (bt, Lk, D)   mask_ref: (bt, Lq, Lk)
        # Batched contraction on the last dims; MXU consumes k untransposed.
        logits = jnp.einsum(
            "bqd,bkd->bqk", q_ref[...], k_ref[...],
            preferred_element_type=jnp.float32,
        )
        # Scale in f32 (same op order as the reference), then add the mask.
        logits = logits * inv_scale + mask_ref[...].astype(jnp.float32)

        # Numerically stable softmax over the last dim.
        row_max = jnp.max(logits, axis=-1, keepdims=True)
        p = jnp.exp(logits - row_max)
        denom = jnp.sum(p, axis=-1, keepdims=True)
        w = p * pl.reciprocal(denom, approx=False)

        # Keep v in its native dtype on the MXU; accumulate in f32.
        out = jnp.einsum(
            "bqk,bkd->bqd", w.astype(v_ref.dtype), v_ref[...],
            preferred_element_type=jnp.float32,
        )
        o_ref[...] = out.astype(o_ref.dtype)

    out_bytes = B * Lq * D * itemsize
    in_bytes = (q.size + k.size + v.size + mask.size) * itemsize
    cost = pl.CostEstimate(
        flops=2 * 2 * B * Lq * Lk * D,          # QK^T + PV matmuls
        transcendentals=B * Lq * Lk,            # exp in the softmax
        bytes_accessed=in_bytes + out_bytes,
    )

    return pl.pallas_call(
        _attn_kernel,
        out_shape=jax.ShapeDtypeStruct((B, Lq, D), q.dtype),
        grid_spec=pltpu.PrefetchScalarGridSpec(
            num_scalar_prefetch=0,
            grid=grid,
            in_specs=[
                pl.BlockSpec((bt, Lq, D), lambda b: (b, 0, 0)),
                pl.BlockSpec((bt, Lk, D), lambda b: (b, 0, 0)),
                pl.BlockSpec((bt, Lk, D), lambda b: (b, 0, 0)),
                pl.BlockSpec((bt, Lq, Lk), lambda b: (b, 0, 0)),
            ],
            out_specs=pl.BlockSpec((bt, Lq, D), lambda b: (b, 0, 0)),
        ),
        compiler_params=pltpu.CompilerParams(
            dimension_semantics=("parallel",),
            vmem_limit_bytes=32 * 1024 * 1024,  # safe on v5e/v6e (128 MiB) and v7x (64 MiB)
        ),
        cost_estimate=cost,
    )(q, k, v, mask)


def _reference(q, k, v, mask):
    D = q.shape[-1]
    logits = jnp.einsum("bqd,bkd->bqk", q, k) / math.sqrt(D)
    logits = logits + mask
    w = jax.nn.softmax(logits, axis=-1)
    return jnp.einsum("bqk,bkd->bqd", w, v)


if __name__ == "__main__":
    EMB = 12
    keys = jax.random.split(jax.random.PRNGKey(0), 8)

    # Shapes from the reference module: B=1, Lq=10, Lk=20, D=12.
    q = jax.random.normal(keys[0], (1, 10, EMB), dtype=jnp.float32)
    k = jax.random.normal(keys[1], (1, 20, EMB), dtype=jnp.float32)
    v = jax.random.normal(keys[2], (1, 20, EMB), dtype=jnp.float32)
    mask = jax.random.normal(keys[3], (1, 10, 20), dtype=jnp.float32)

    out = jax.block_until_ready(attention(q, k, v, mask))
    ref = _reference(q, k, v, mask)
    assert out.shape == (1, 10, EMB)
    assert jnp.allclose(out, ref, atol=2e-3, rtol=2e-3)

    # Batched case: all 8 batch elements should collapse into one grid step.
    B2 = 8
    q2 = jax.random.normal(keys[4], (B2, 10, EMB), dtype=jnp.float32)
    k2 = jax.random.normal(keys[5], (B2, 20, EMB), dtype=jnp.float32)
    v2 = jax.random.normal(keys[6], (B2, 20, EMB), dtype=jnp.float32)
    mask2 = jax.random.normal(keys[7], (B2, 10, 20), dtype=jnp.float32)

    out2 = jax.block_until_ready(attention(q2, k2, v2, mask2))
    ref2 = _reference(q2, k2, v2, mask2)
    assert out2.shape == (B2, 10, EMB)
    assert jnp.allclose(out2, ref2, atol=2e-3, rtol=2e-3)

    print("KERNEL_OK")
</pallas_src>

<mosaic_0001>
module attributes {stable_mosaic.version = 11 : i64} {
  func.func @_attn_kernel(%arg0: i32, %arg1: memref<1x10x12xf32, #tpu.memory_space<vmem>>, %arg2: memref<1x20x12xf32, #tpu.memory_space<vmem>>, %arg3: memref<1x20x12xf32, #tpu.memory_space<vmem>>, %arg4: memref<1x10x20xf32, #tpu.memory_space<vmem>>, %arg5: memref<1x10x12xf32, #tpu.memory_space<vmem>>) attributes {dimension_semantics = [#tpu.dimension_semantics<parallel>], iteration_bounds = array<i64: 1>, scalar_prefetch = 0 : i64, scratch_operands = 0 : i64, tpu.core_type = #tpu.core_type<tc>, window_params = [{transform_indices = @transform_0, window_bounds = array<i64: 1, 10, 12>}, {transform_indices = @transform_1, window_bounds = array<i64: 1, 20, 12>}, {transform_indices = @transform_2, window_bounds = array<i64: 1, 20, 12>}, {transform_indices = @transform_3, window_bounds = array<i64: 1, 10, 20>}, {transform_indices = @transform_4, window_bounds = array<i64: 1, 10, 12>}]} {
    %c0 = arith.constant 0 : index
    %c0_0 = arith.constant 0 : index
    %c0_1 = arith.constant 0 : index
    %0 = vector.load %arg1[%c0, %c0_0, %c0_1] : memref<1x10x12xf32, #tpu.memory_space<vmem>>, vector<1x10x12xf32>
    %c0_2 = arith.constant 0 : index
    %c0_3 = arith.constant 0 : index
    %c0_4 = arith.constant 0 : index
    %1 = vector.load %arg2[%c0_2, %c0_3, %c0_4] : memref<1x20x12xf32, #tpu.memory_space<vmem>>, vector<1x20x12xf32>
    "tpu.trace_start"() <{level = 10 : i32, message = "bqd,bkd->bqk"}> : () -> ()
    %cst = arith.constant dense<0.000000e+00> : vector<1x10x20xf32>
    %2 = tpu.matmul %0, %1, %cst {dimension_numbers = #tpu.dot_dimension_numbers<[2], [2], [1], [1], [0, 0, 0, 1, 1, 1], [0], [0]>} : vector<1x10x12xf32>, vector<1x20x12xf32>, vector<1x10x20xf32> -> vector<1x10x20xf32>
    "tpu.trace_stop"() : () -> ()
    %cst_5 = arith.constant 0.288675129 : f32
    %3 = vector.broadcast %cst_5 : f32 to vector<1x10x20xf32>
    %4 = arith.mulf %2, %3 : vector<1x10x20xf32>
    %c0_6 = arith.constant 0 : index
    %c0_7 = arith.constant 0 : index
    %c0_8 = arith.constant 0 : index
    %5 = vector.load %arg4[%c0_6, %c0_7, %c0_8] : memref<1x10x20xf32, #tpu.memory_space<vmem>>, vector<1x10x20xf32>
    %6 = arith.addf %4, %5 : vector<1x10x20xf32>
    %cst_9 = arith.constant dense<0xFF800000> : vector<1x10xf32>
    %7 = vector.multi_reduction <maximumf>, %6, %cst_9 [2] : vector<1x10x20xf32> to vector<1x10xf32>
    %8 = vector.shape_cast %7 : vector<1x10xf32> to vector<1x10x1xf32>
    %9 = vector.broadcast %8 : vector<1x10x1xf32> to vector<1x10x20xf32>
    %10 = arith.subf %6, %9 : vector<1x10x20xf32>
    %11 = math.exp %10 : vector<1x10x20xf32>
    %cst_10 = arith.constant dense<0.000000e+00> : vector<1x10xf32>
    %12 = vector.multi_reduction <add>, %11, %cst_10 [2] : vector<1x10x20xf32> to vector<1x10xf32>
    %13 = vector.shape_cast %12 : vector<1x10xf32> to vector<1x10x1xf32>
    %14 = tpu.reciprocal %13 : vector<1x10x1xf32> -> vector<1x10x1xf32>
    %15 = vector.broadcast %14 : vector<1x10x1xf32> to vector<1x10x20xf32>
    %16 = arith.mulf %11, %15 : vector<1x10x20xf32>
    %c0_11 = arith.constant 0 : index
    %c0_12 = arith.constant 0 : index
    %c0_13 = arith.constant 0 : index
    %17 = vector.load %arg3[%c0_11, %c0_12, %c0_13] : memref<1x20x12xf32, #tpu.memory_space<vmem>>, vector<1x20x12xf32>
    "tpu.trace_start"() <{level = 10 : i32, message = "bqk,bkd->bqd"}> : () -> ()
    %cst_14 = arith.constant dense<0.000000e+00> : vector<1x10x12xf32>
    %18 = tpu.matmul %16, %17, %cst_14 {dimension_numbers = #tpu.dot_dimension_numbers<[2], [1], [1], [2], [0, 0, 0, 1, 1, 2], [0], [0]>} : vector<1x10x20xf32>, vector<1x20x12xf32>, vector<1x10x12xf32> -> vector<1x10x12xf32>
    "tpu.trace_stop"() : () -> ()
    %c0_15 = arith.constant 0 : index
    %c0_16 = arith.constant 0 : index
    %c0_17 = arith.constant 0 : index
    %19 = vector.load %arg5[%c0_15, %c0_16, %c0_17] : memref<1x10x12xf32, #tpu.memory_space<vmem>>, vector<1x10x12xf32>
    tpu.vector_store %arg5[%c0_15, %c0_16, %c0_17], %18 {strides = array<i32>} : memref<1x10x12xf32, #tpu.memory_space<vmem>>, vector<1x10x12xf32>,
    return
  }
  func.func @transform_0(%arg0: i32) -> (i32, i32, i32) {
    %c0_i32 = arith.constant 0 : i32
    %c0_i32_0 = arith.constant 0 : i32
    %c0_i32_1 = arith.constant 0 : i32
    return %arg0, %c0_i32, %c0_i32_0 : i32, i32, i32
  }
  func.func @transform_1(%arg0: i32) -> (i32, i32, i32) {
    %c0_i32 = arith.constant 0 : i32
    %c0_i32_0 = arith.constant 0 : i32
    %c0_i32_1 = arith.constant 0 : i32
    return %arg0, %c0_i32, %c0_i32_0 : i32, i32, i32
  }
  func.func @transform_2(%arg0: i32) -> (i32, i32, i32) {
    %c0_i32 = arith.constant 0 : i32
    %c0_i32_0 = arith.constant 0 : i32
    %c0_i32_1 = arith.constant 0 : i32
    return %arg0, %c0_i32, %c0_i32_0 : i32, i32, i32
  }
  func.func @transform_3(%arg0: i32) -> (i32, i32, i32) {
    %c0_i32 = arith.constant 0 : i32
    %c0_i32_0 = arith.constant 0 : i32
    %c0_i32_1 = arith.constant 0 : i32
    return %arg0, %c0_i32, %c0_i32_0 : i32, i32, i32
  }
  func.func @transform_4(%arg0: i32) -> (i32, i32, i32) {
    %c0_i32 = arith.constant 0 : i32
    %c0_i32_0 = arith.constant 0 : i32
    %c0_i32_1 = arith.constant 0 : i32
    return %arg0, %c0_i32, %c0_i32_0 : i32, i32, i32
  }
}

</mosaic_0001>

<bundles_post_ra>
// kernel: tpu_custom_call.1
= control target key start
LH: loop header
LB: loop body
LE: loop exit
PB: predicated region body
PF: predicated region fallthrough
CT: control target
= control target key end

     0   :  { %vm22_vm0 = vcmask 97280   ;;  %vm119_vm2 = vcmask 162816   ;;  %vm123_vm3 = vcmask 156672   ;;  %vm152_vm4 = vcmask 1043456   ;;  %s364_s1 = inlined_call_operand.vmem [shape: f32[1,20,12], index: 1, kind: input, shape index: {}]   ;;  %s365_s0 = inlined_call_operand.vmem [shape: f32[1,10,12], index: 0, kind: input, shape index: {}]   ;;  %s366_s3 = inlined_call_operand.vmem [shape: f32[1,10,20], index: 3, kind: input, shape index: {}]   ;;  %s367_s2 = inlined_call_operand.vmem [shape: f32[1,20,12], index: 2, kind: input, shape index: {}]   ;;  %s368_s4 = inlined_call_operand.vmem [shape: f32[1,10,12], index: 4, kind: output, shape index: {}]  }
   0x1   :  { %v19_v0 = vld [vmem:[%s364_s1] sm:$0xff]  ;;  %v20_v1 = vld [vmem:[%s364_s1 + $0x8] sm:$0xff]  ;;  %vm275_vm1 = vmpackc.low %vm22_vm0, %vm22_vm0  ;;  %vm232_vm5 = vcmask 91136  }
   0x2   :  { %v274_v2 = vpack.c.bf16 %v20_v1, %v19_v0  ;;  %v17_v3 = vld [vmem:[%s365_s0] sm:$0xff]  ;;  %v21_v4 = vld [vmem:[%s364_s1 + $0x10] sm:$0xf]  ;;  %v18_v5 = vld [vmem:[%s365_s0 + $0x8] sm:$0x3] }
   0x3   :  { %262 = vmatprep.mubr.msk.f32.mxu0 %vm22_vm0, %v17_v3  ;;  %v115_v8 = vld [vmem:[%s366_s3] sm:$0xff]  ;;  %v116_v11 = vld [vmem:[%s366_s3 + $0x8] sm:$0x3]  ;;  %v145_v29 = vld [vmem:[%s367_s2 + $0x10] sm:$0xf] }
   0x4   :  { %276 = vmatprep.subr.msk.bf16.mxu0 %vm275_vm1, %v274_v2  ;;  %v143_v26 = vld [vmem:[%s367_s2] sm:$0xff]  ;;  %v144_v27 = vld [vmem:[%s367_s2 + $0x8] sm:$0xff] }
   0x5   :  { %279 = vmatpush3.bf16.xpose.msk.msra.mxu0 %vm275_vm1, %v274_v2  ;;  %v280_v28 = vpack.c.bf16 %v144_v27, %v143_v26 }
   0x6   :  { %260 = vmatprep.subr.msk.mxu0 %vm22_vm0, %v21_v4 }
   0x7   :  { %281 = vmatprep.subr.bf16.mxu1 %v280_v28 }
   0x8   :  { %283 = vmatpush3.bf16.msra.mxu1 %v280_v28 }
   0x9   :  { %269 = vmatprep.subr.msk.mxu1 %vm152_vm4, %v145_v29 }
   0xc   :  { %270 = vmatpush3.msk.msra.mxu1 %vm152_vm4, %v145_v29 }
   0xd   :  { %261 = vmatpush3.xpose.msk.msra.mxu0 %vm22_vm0, %v21_v4 }
  0x10   :  { %263 = vmatmul.mubr.msk.f32.vlgmr.msra.gmra.mrb[0].mxu0 %vm22_vm0, %v18_v5 }
  0xe3   :  { %v264_v6 = vpop.f32.mrb[0].mxu0 }
  0xe4   :  { %v104_v7 = vpop.f32.mrb[1].mxu0  ;;  %v114_v9 = vmul.f32 0.28867513, %v264_v6 }
  0xe5   :  { %v113_v10 = vmul.f32 0.28867513, %v104_v7 }
  0xe6   :  { %v118_v14 = vadd.f32 %v116_v11, %v114_v9 }
  0xe7   :  { %v117_v12 = vadd.f32 %v115_v8, %v113_v10 }
  0xe8   :  { %v124_v15 = vsel %vm123_vm3, %v118_v14, -inf }
  0xe9   :  { %v120_v13 = vsel %vm119_vm2, %v117_v12, -inf }
  0xea   :  { %121 = vmax.xlane.f32.xlu0 %v120_v13 }
  0xee   :  { %125 = vmax.xlane.f32.xlu0 %v124_v15 }
 0x177   :  { %v122_v16 = vpop.xlane.xlu0 %121 }
 0x178   :  { %v127_v17 = vsub.f32 %v117_v12, %v122_v16 }
 0x17a   :  { %v129_v18 = vmul.f32 1.442695, %v127_v17 }
 0x17b   :  { %v126_v19 = vpop.xlane.xlu0 %125 }
 0x17c   :  { %284 = vpow2.f32 %v129_v18  ;;  %v128_v20 = vsub.f32 %v118_v14, %v126_v19 }
 0x17e   :  { %v131_v21 = vmul.f32 1.442695, %v128_v20 }
 0x180   :  { %286 = vpow2.f32 %v131_v21 }
 0x186   :  { %v285_v22 = vpop.eup %284 }
 0x187   :  { %v133_v23 = vsel %vm119_vm2, %v285_v22, 0.0 }
 0x188   :  { %134 = vadd.xlane.f32.xlu1 %v133_v23 }
 0x18a   :  { %v287_v24 = vpop.eup %286 }
 0x18b   :  { %v136_v25 = vsel %vm123_vm3, %v287_v24, 0.0 }
 0x18c   :  { %137 = vadd.xlane.f32.xlu1 %v136_v25 }
 0x215   :  { %v135_v30 = vpop.xlane.xlu1 %134 }
 0x216   :  { %288 = vrcp.f32 %v135_v30 }
 0x219   :  { %v138_v31 = vpop.xlane.xlu1 %137 }
 0x21a   :  { %290 = vrcp.f32 %v138_v31 }
 0x220   :  { %v289_v32 = vpop.eup %288 }
 0x221   :  { %v141_v33 = vmul.f32 %v289_v32, %v285_v22 }
 0x223   :  { %271 = vmatprep.mubr.msk.f32.mxu1 %vm119_vm2, %v141_v33 }
 0x224   :  { %v291_v34 = vpop.eup %290 }
 0x225   :  { %v142_v35 = vmul.f32 %v291_v34, %v287_v24 }
 0x227   :  { %272 = vmatmul.mubr.msk.f32.vlgmr.msra.gmra.mrb[0].mxu1 %vm119_vm2, %v142_v35 }
 0x2fa   :  { %v273_v36 = vpop.f32.mrb[0].mxu1 }
 0x2fb   :  { %233 = vst.msk [vmem:[%s368_s4 + $0x8] sm:$0x3] %vm232_vm5, %v273_v36  ;;  %v222_v37 = vpop.f32.mrb[1].mxu1 }
 0x2fc   :  { %231 = vst.msk [vmem:[%s368_s4] sm:$0xff] %vm22_vm0, %v222_v37 }

</bundles_post_ra>
